<compile_context>
chip_gen: v7x
topology: tpu7x:2x2x1
jax: 0.10.0
libtpu: 0.0.40
codegen_flags: <defaults>
</compile_context>

<pallas_src>
import jax
import jax.numpy as jnp
import numpy as np
from jax.experimental import pallas as pl
from jax.experimental.pallas import tpu as pltpu

CODES = dict(zip("ACGTNP", range(6)))
PAD_CODE = CODES["P"]
NUM_OUT_CHANNELS = 4

MIN_LANE_TILE = 128        # vreg lane width
MAX_LANE_TILE = 32768      # 512 KiB f32 output per block
MIN_BLOCKS = 8             # aim for >= 8 grid steps (pipelining, v7x megacore)

# ASCII -> code lookup table (upper and lower case, matching seq.upper()); -1 = invalid.
_ASCII_LUT = np.full(256, -1, dtype=np.int8)
for _ch, _v in CODES.items():
    _ASCII_LUT[ord(_ch)] = _v
    _ASCII_LUT[ord(_ch.lower())] = _v


def _round_up(x: int, m: int) -> int:
    return ((x + m - 1) // m) * m


def _choose_tile(L: int) -> int:
    """Lane tile: big enough to amortize ~0.35us/step, small enough for >=MIN_BLOCKS steps."""
    tile = _round_up(pl.cdiv(L, MIN_BLOCKS), MIN_LANE_TILE)
    return int(min(MAX_LANE_TILE, max(MIN_LANE_TILE, tile)))


def _seq2tensor_kernel(codes_ref, out_ref):
    """codes_ref: (1, TL) int8 in VMEM.  out_ref: (4, TL) {f32|bf16} in VMEM."""
    tl = codes_ref.shape[1]
    codes = codes_ref[...].astype(jnp.int32)                                  # (1, TL)
    ch = jax.lax.broadcasted_iota(jnp.int32, (NUM_OUT_CHANNELS, tl), 0)       # (4, TL)
    onehot = (codes == ch).astype(jnp.float32)                                # broadcast (1,TL)->(4,TL)
    vals = jnp.where(codes == 4, jnp.float32(0.25), onehot)                   # 'N' -> 0.25s
    # code 5 ('P' padding) falls through to all-zeros, matching one_hot(...,6)[:, :4].
    out_ref[...] = vals.astype(out_ref.dtype)


def _run_kernel(codes_2d: jax.Array, L: int, tile: int, out_dtype) -> jax.Array:
    """codes_2d: int8 (1, L).  Returns (4, L) of out_dtype — no padding, no trim."""
    grid = (pl.cdiv(L, tile),)
    out_itemsize = np.dtype(out_dtype).itemsize
    bytes_accessed = int(L * (1 + NUM_OUT_CHANNELS * out_itemsize))   # ~1 B in, 4*itemsize out
    return pl.pallas_call(
        _seq2tensor_kernel,
        out_shape=jax.ShapeDtypeStruct((NUM_OUT_CHANNELS, L), out_dtype),
        grid=grid,
        in_specs=[pl.BlockSpec((1, tile), lambda i: (0, i))],
        out_specs=pl.BlockSpec((NUM_OUT_CHANNELS, tile), lambda i: (0, i)),
        compiler_params=pltpu.CompilerParams(dimension_semantics=("parallel",)),
        cost_estimate=pl.CostEstimate(
            flops=0, transcendentals=0, bytes_accessed=bytes_accessed
        ),
    )(codes_2d)


def seq2tensor_pad_codes(codes: np.ndarray, *, out_dtype=jnp.float32) -> jax.Array:
    """codes: integer array (L,) in {0..5}.  Returns (4, L) of out_dtype."""
    codes = np.ascontiguousarray(np.asarray(codes, dtype=np.int8).reshape(1, -1))
    L = codes.shape[1]
    tile = _choose_tile(L)
    return _run_kernel(jnp.asarray(codes), L, tile, out_dtype)


def seq2tensor_pad(seq, *, out_dtype=jnp.float32) -> jax.Array:
    """Mirrors Seq2Tensor_pad.forward.

    If `seq` is already a float array it is returned unchanged (passthrough
    branch); otherwise it is treated as a nucleotide string over 'ACGTNP'
    (case-insensitive, matching seq.upper() in the reference).
    """
    if isinstance(seq, (jax.Array, np.ndarray)) and jnp.issubdtype(
        jnp.asarray(seq).dtype, jnp.floating
    ):
        return jnp.asarray(seq)
    raw = np.frombuffer(seq.encode("ascii"), dtype=np.uint8)
    codes = _ASCII_LUT[raw]
    if np.any(codes < 0):
        bad = chr(int(raw[np.argmax(codes < 0)]))
        raise KeyError(bad)  # same failure mode as the PyTorch dict lookup
    return seq2tensor_pad_codes(codes, out_dtype=out_dtype)


def _reference_numpy(seq: str) -> np.ndarray:
    """Pure-numpy re-implementation of the PyTorch forward for verification."""
    codes = np.asarray([CODES[ch.upper()] for ch in seq], dtype=np.int64)
    one_hot = np.zeros((len(codes), 6), dtype=np.float32)
    one_hot[np.arange(len(codes)), codes] = 1.0
    one_hot[one_hot[:, 4] == 1] = 0.25
    return one_hot[:, :4].T  # (4, L)


if __name__ == "__main__":
    key = jax.random.PRNGKey(0)
    k1, k2 = jax.random.split(key)
    alphabet = np.array(list("ACGTNPacgtnp"))

    # Case 1: L=200 -> tile=128, grid=2 with a ragged last block.
    L = 200
    idx = np.asarray(jax.random.randint(k1, (L,), 0, len(alphabet)))
    seq = "".join(alphabet[idx])
    out = jax.block_until_ready(seq2tensor_pad(seq))
    ref = _reference_numpy(seq)
    assert out.shape == (4, L), out.shape
    assert out.dtype == jnp.float32
    np.testing.assert_array_equal(np.asarray(out), ref)

    # Case 2: L=777 -> 7 grid blocks, last block only 9 valid lanes (masked write).
    L2 = 777
    idx2 = np.asarray(jax.random.randint(k2, (L2,), 0, len(alphabet)))
    seq2 = "".join(alphabet[idx2])
    out2 = jax.block_until_ready(seq2tensor_pad(seq2))
    assert out2.shape == (4, L2)
    np.testing.assert_array_equal(np.asarray(out2), _reference_numpy(seq2))

    # Case 3: bf16 output variant ({0, 0.25, 1} are exact in bf16).
    out_bf16 = jax.block_until_ready(seq2tensor_pad(seq, out_dtype=jnp.bfloat16))
    assert out_bf16.dtype == jnp.bfloat16
    np.testing.assert_array_equal(np.asarray(out_bf16.astype(jnp.float32)), ref)

    # Case 4: float passthrough branch (matches `isinstance(seq, torch.FloatTensor)`).
    passthrough = seq2tensor_pad(out)
    assert passthrough is out or bool(jnp.all(passthrough == out))

    print("KERNEL_OK")
</pallas_src>

<mosaic_0001>
module attributes {stable_mosaic.version = 11 : i64} {
  func.func @_seq2tensor_kernel(%arg0: i32, %arg1: memref<1x128xi8, #tpu.memory_space<vmem>>, %arg2: memref<4x128xf32, #tpu.memory_space<vmem>>) attributes {dimension_semantics = [#tpu.dimension_semantics<parallel>], iteration_bounds = array<i64: 2>, scalar_prefetch = 0 : i64, scratch_operands = 0 : i64, tpu.core_type = #tpu.core_type<tc>, window_params = [{transform_indices = @transform_0, window_bounds = array<i64: 1, 128>}, {transform_indices = @transform_1, window_bounds = array<i64: 4, 128>}]} {
    %c0 = arith.constant 0 : index
    %c0_0 = arith.constant 0 : index
    %0 = vector.load %arg1[%c0, %c0_0] : memref<1x128xi8, #tpu.memory_space<vmem>>, vector<1x128xi8>
    %1 = arith.extsi %0 : vector<1x128xi8> to vector<1x128xi32>
    %2 = tpu.iota {dimensions = array<i32: 0>} : vector<4x128xi32>
    %3 = vector.broadcast %1 : vector<1x128xi32> to vector<4x128xi32>
    %4 = arith.cmpi eq, %3, %2 : vector<4x128xi32>
    %5 = arith.extui %4 : vector<4x128xi1> to vector<4x128xi32>
    %6 = arith.sitofp %5 : vector<4x128xi32> to vector<4x128xf32>
    %c4_i32 = arith.constant 4 : i32
    %7 = vector.broadcast %c4_i32 : i32 to vector<1x128xi32>
    %8 = arith.cmpi eq, %1, %7 : vector<1x128xi32>
    %cst = arith.constant 2.500000e-01 : f32
    %9 = vector.shape_cast %8 : vector<1x128xi1> to vector<1x128xi1>
    %10 = vector.broadcast %9 : vector<1x128xi1> to vector<4x128xi1>
    %11 = vector.broadcast %cst : f32 to vector<4x128xf32>
    %12 = arith.select %10, %11, %6 : vector<4x128xi1>, vector<4x128xf32>
    %c0_1 = arith.constant 0 : index
    %c0_2 = arith.constant 0 : index
    %13 = vector.load %arg2[%c0_1, %c0_2] : memref<4x128xf32, #tpu.memory_space<vmem>>, vector<4x128xf32>
    tpu.vector_store %arg2[%c0_1, %c0_2], %12 {strides = array<i32>} : memref<4x128xf32, #tpu.memory_space<vmem>>, vector<4x128xf32>,
    return
  }
  func.func @transform_0(%arg0: i32) -> (i32, i32) {
    %c0_i32 = arith.constant 0 : i32
    %c0_i32_0 = arith.constant 0 : i32
    return %c0_i32, %arg0 : i32, i32
  }
  func.func @transform_1(%arg0: i32) -> (i32, i32) {
    %c0_i32 = arith.constant 0 : i32
    %c0_i32_0 = arith.constant 0 : i32
    return %c0_i32, %arg0 : i32, i32
  }
}

</mosaic_0001>

<bundles_post_ra>
// kernel: tpu_custom_call.1
= control target key start
LH: loop header
LB: loop body
LE: loop exit
PB: predicated region body
PF: predicated region fallthrough
CT: control target
= control target key end

     0   :  { %6 = vsyncpa [#allocation3], 0  ;;  %s563_s0 = inlined_call_operand.hbm [shape: s8[1,200], index: 0, kind: input, shape index: {}]   ;;  %s564_s1 = inlined_call_operand.hbm [shape: f32[4,200], index: 1, kind: output, shape index: {}]  }
   0x1   :  { %8 = vsyncpa [#allocation3 + $0x1], 0 }
   0x2   :  { %9 = vsyncpa [#allocation4], 0 }
   0x3   :  { %11 = vsyncpa [#allocation4 + $0x1], 0  ;;  %s401_s6 = smov 0   ;;  %s403_s7 = smov 0  }
   0x4   :  { %s405_s8 = smov 0   ;;  %s407_s9 = smov 0  }
   0x5 LB: > { %s422_s10 = sadd.s32 4294967295, %s385_s9   ;;  %s230_s11 = sadd.s32 4294967294, %s385_s9   ;;  %s385_s9 = sphi %s407_s9, %s579_s9   ;;  %s381_s8 = sphi %s405_s8, %s578_s8   ;;  %s377_s7 = sphi %s403_s7, %s577_s7   ;;  %s373_s6 = sphi %s401_s6, %s576_s6  }
   0x6   : > { %s426_s12 = sadd.s32 1, %s385_s9   ;;  %s24_s13 = sadd.s32 1, %s381_s8 }
   0x7   : > { %s21_s14 = ssub.s32 %s385_s9, %s426_s12  ;;  %p31_p0 = scmp.ne.s32.totalorder %s381_s8, %s377_s7 }
   0x8   : > { %p22_p1 = scmp.eq.s32.totalorder %s21_s14, 0  ;;  %p32_p2 = scmp.eq.s32.totalorder %s385_s9, 0 }
   0x9   : > { %p37_p3 = scmp.ne.s32.totalorder %s377_s7, %s373_s6  ;;  %p38_p4 = scmp.eq.s32.totalorder %s422_s10, 0 }
   0xa   : > { %s438_s15 = scalar_select %p22_p1, %s381_s8, %s24_s13  }
   0xb   : > { %p440_p5 = por %p32_p2, %p31_p0  ;;  %p444_p6 = por %p38_p4, %p37_p3 }
   0xc   : > { %p61_p7 = scmp.eq.s32.totalorder %s422_s10, 1  ;;  %p67_p8 = scmp.eq.s32.totalorder %s230_s11, 1 }
   0xd   : > { %p253_p10 = scmp.lt.s32.totalorder %s385_s9, 2  ;;  %s87_s20 = sand.u32 1, %s381_s8  }
   0xe   : > { %p451_p11 = por %p61_p7, %p31_p0  ;;  %p455_p12 = por %p67_p8, %p37_p3 }
   0xf   : > { %s233_s21 = sshll.u32 %s385_s9, 4  ;;  %s90_s25 = scalar_lea.vmem [#allocation2], %s87_s20 }
  0x10   : > { %s568_s18 = scalar_select %p451_p11, 1, 0 }
  0x11   : > { %s569_s19 = scalar_select %p455_p12, 1, 0 }
  0x12   : > { %s464_s24 = scalar_lea.hbm %s563_s0, %s233_s21  ;;  %s97_s26 = sshll.u32 %s90_s25, 4  ;;  %s466_s26 = int_to_ptr.vmem [resolvable:$true] %s97_s26 }
  0x13   : > { %p470_p13 = pnand %p253_p10, %p440_p5  ;;  %s88_s28 = scalar_lea.sflag [#allocation3], %s87_s20 }
  0x14   : > { %s289_s29 = scalar_lea.hbm %s464_s24, 16  ;;  %s294_s3 = scalar_lea.hbm %s563_s0, 32 }
  0x15   : > { %p290_p2 = scmp.ne.s32.totalorder %s464_s24, %s289_s29  ;;  %p291_p3 = pneg %p470_p13 }
  0x16   : > { %p295_p5 = scmp.lt.u32.totalorder %s464_s24, %s563_s0  ;;  %p296_p8 = scmp.lt.u32.totalorder %s294_s3, %s289_s29 }
  0x17   : > { %p292_p4 = pnand %p291_p3, %p290_p2  ;;  %p298_p9 = scmp.lt.u32.totalorder %s289_s29, %s464_s24 }
  0x18   : > { %p297_p10 = por %p296_p8, %p295_p5 }
  0x19   : > { %p293_p7 = pneg %p292_p4 }
  0x1a   : > { %p299_p0 = por %p298_p9, %p297_p10 }
  0x1c   : > { %p300_p1 = pnand %p299_p0, %p293_p7 }
  0x1e   : > { %303 = shalt.err (!%p300_p1)
}
  0x1f   : > { %s304_s11 = scalar_lea.vmem %s466_s26, 16  ;;  %s387_s13 = smov [#allocation2]  }
  0x20   : > { %p305_p2 = scmp.ne.s32.totalorder %s466_s26, %s304_s11  ;;  %s309_s14 = sshll.u32 %s387_s13, 4  ;;  %s310_s14 = int_to_ptr.vmem [resolvable:$false] %s309_s14 }
  0x21   : > { %s311_s16 = scalar_lea.vmem %s310_s14, 32  ;;  %p312_p11 = scmp.lt.s32.totalorder %s466_s26, %s310_s14 }
  0x22   : > { %p307_p4 = pnand %p305_p2, %p291_p3  ;;  %p313_p5 = scmp.lt.s32.totalorder %s311_s16, %s304_s11 }
  0x24   : > { %p308_p12 = pneg %p307_p4  ;;  %p314_p8 = por %p313_p5, %p312_p11 }
  0x26   : > { %p315_p9 = pnand %p314_p8, %p308_p12 }
  0x28   : > { %318 = shalt.err (!%p315_p9)
}
  0x29   : > { %248 = dma.hbm_to_vmem [thread:$0]  (!%p470_p13), %s464_s24, 16, %s466_s26, %s88_s28  }
  0x2a   : > { %p571_p0 = scmp.lt.s32.totalorder %s385_s9, 3  ;;  %p572_p1 = scmp.ge.s32.totalorder %s385_s9, 1 }
  0x2c   : > { %p103_p3 = pnand %p572_p1, %p571_p0 }
  0x2d   : > { %s506_s20 = sand.u32 (!%p103_p3), 1, %s377_s7  }
  0x2e   : > { %106 = sbr.rel (%p103_p3) target bundleno = 80 (0x50), region = 24  ;;  %s109_s21 = scalar_lea.sflag (!%p103_p3), [#allocation3], %s506_s20 }
  0x2f   : > { %s111_s22 = scalar_lea.vmem (!%p103_p3), [#allocation2], %s506_s20 }
  0x35   : > { %364 = dma.done.wait (%p444_p6), %s109_s21, 16  }
  0x36   : > { %366 = vsyncadd (%p444_p6), %s109_s21, 4294967280  ;;  %v131_v0 = vlaneseq  ;;  %s235_s23 = sshll.u32 %s506_s20, 2  ;;  %v129_v3 = vld [vmem:[%s111_s22] sm:$0x1]  ;;  %v388_v6 = vmov 0   ;;  %s238_s26 = sshll.u32 %s422_s10, 6 }
  0x37   : > { %v130_v4 = vunpack.c.0.s8 %v129_v3  ;;  %s128_s24 = scalar_lea.vmem [#allocation5], %s235_s23  ;;  %v389_v9 = vmov 0.0   ;;  %s521_s28 = scalar_lea.hbm %s564_s1, %s238_s26 }
  0x38   : > { %v132_v1 = vshrl.u32 %v131_v0, 7  ;;  %s163_s25 = sshll.u32 %s128_s24, 4  ;;  %s150_s29 = scalar_lea.sflag [#allocation4], %s506_s20  ;;  %s516_s25 = int_to_ptr.vmem [resolvable:$true] %s163_s25 }
  0x39   : > { %vm140_vm0 = vcmp.eq.s32.totalorder %v130_v4, 4  ;;  %s319_s30 = scalar_lea.vmem %s516_s25, 64  ;;  %p573_p11 = scmp.ne.s32.totalorder %s568_s18, 0 }
  0x3a   : > { %v135_v2 = vsub.s32 0, %v132_v1  ;;  %v141_v7 = vsel %vm140_vm0, 1, %v388_v6  ;;  %p320_p6 = scmp.ne.s32.totalorder %s516_s25, %s319_s30  ;;  %s390_s10 = smov [#allocation5]  }
  0x3b   : > { %s323_s2 = sshll.u32 %s390_s10, 4  ;;  %s324_s2 = int_to_ptr.vmem [resolvable:$false] %s323_s2 }
  0x3c   : > { %v136_v5 = vrot.slane %v130_v4, %v135_v2  ;;  %v145_v8 = vrot.slane %v141_v7, %v135_v2  ;;  %p321_p12 = pnand %p320_p6, %p573_p11  ;;  %s325_s3 = scalar_lea.vmem %s324_s2, 128 }
  0x3d   : > { %p326_p7 = scmp.lt.s32.totalorder %s516_s25, %s324_s2  ;;  %p327_p10 = scmp.lt.s32.totalorder %s325_s3, %s319_s30 }
  0x3e   : > { %vm137_vm1 = vcmp.eq.s32.totalorder %v136_v5, %v132_v1  ;;  %vm146_vm2 = vcmp.eq.s32.totalorder %v145_v8, 1  ;;  %p322_p13 = pneg %p321_p12 }
  0x3f   : > { %v236_v10 = vsel %vm137_vm1, 1.0, %v389_v9  ;;  %p328_p2 = por %p327_p10, %p326_p7 }
  0x40   : > { %v147_v11 = vsel %vm146_vm2, 0.25, %v236_v10 }
  0x41   : > { %148 = vst [vmem:[%s128_s24] sm:$0xf] %v147_v11  ;;  %p329_p4 = pnand %p328_p2, %p322_p13 }
  0x43   : > { %332 = shalt.err (!%p329_p4)
}
  0x44   : > { %s333_s4 = scalar_lea.hbm %s521_s28, 64  ;;  %s337_s13 = scalar_lea.hbm %s564_s1, 128 }
  0x45   : > { %p334_p5 = scmp.ne.s32.totalorder %s521_s28, %s333_s4  ;;  %p338_p0 = scmp.lt.u32.totalorder %s521_s28, %s564_s1 }
  0x46   : > { %p339_p1 = scmp.lt.u32.totalorder %s337_s13, %s333_s4  ;;  %p341_p6 = scmp.lt.u32.totalorder %s333_s4, %s521_s28 }
  0x47   : > { %p335_p8 = pnand %p334_p5, %p573_p11 }
  0x48   : > { %p340_p3 = por %p339_p1, %p338_p0 }
  0x49   : > { %p336_p9 = pneg %p335_p8 }
  0x4a   : > { %p342_p12 = por %p341_p6, %p340_p3 }
  0x4c   : > { %p343_p13 = pnand %p342_p12, %p336_p9 }
  0x4e   : > { %346 = shalt.err (!%p343_p13)
}
  0x4f   : > { %243 = dma.vmem_to_hbm [thread:$0]  (%p573_p11), %s516_s25, 64, %s521_s28, %s150_s29  }
  0x50 PF: > { %s175_s20 = sand.u32 1, %s373_s6   ;;  %p574_p7 = scmp.ne.s32.totalorder %s569_s19, 0 }
  0x51   : > { %p575_p10 = scmp.ge.s32.totalorder %s385_s9, 2  ;;  %s176_s21 = scalar_lea.sflag [#allocation4], %s175_s20 }
  0x53   : > { %p250_p2 = pnand %p575_p10, %p574_p7 }
  0x55   : > { %368 = dma.done.wait (!%p250_p2), %s176_s21, 64  }
  0x56   : > { %370 = vsyncadd (!%p250_p2), %s176_s21, 4294967232  ;;  %p14_p4 = scmp.ge.s32.totalorder %s426_s12, 4   ;;  %s576_s6 = smov %s377_s7 }
  0x57   : > { %s577_s7 = smov %s381_s8  ;;  %s578_s8 = smov %s438_s15 }
  0x58   : > { %s579_s9 = smov %s426_s12  ;;  %16 = sbr.rel (!%p14_p4) target bundleno = 5 (0x5), region = 69 }
  0x5f   :  { %181 = vsyncpa [#allocation3], 1 }
  0x60   :  { %183 = vsyncpa [#allocation3 + $0x1], 1 }
  0x61   :  { %184 = vsyncpa [#allocation4], 1 }
  0x62   :  { %186 = vsyncpa [#allocation4 + $0x1], 1 }

</bundles_post_ra>
